<compile_context>
chip_gen: v7x
topology: tpu7x:2x2x1
jax: 0.10.0
libtpu: 0.0.40
codegen_flags: <defaults>
</compile_context>

<pallas_src>
import jax
import jax.numpy as jnp
from jax.experimental import pallas as pl
from jax.experimental.pallas import tpu as pltpu


def _decoder_block_kernel(xc_ref, w1_ref, bias_ref, w2_ref, b2_ref, out_ref):
    # xc_ref : (1, TM, Kp)        bf16   im2col rows for this tile
    # w1_ref : (Kp, Cmid_p)       bf16   conv3x3 weight with BN scale folded in
    # bias_ref: (1, Cmid_p)       f32    folded conv-bias + BN shift
    # w2_ref : (Cmid_p, 4*Cout_p) bf16   tconv weight, tap-major columns
    # b2_ref : (1, 4*Cout_p)      f32    tconv bias tiled per tap
    # out_ref: (1, TM, 4*Cout_p)  f32
    acc = jnp.dot(xc_ref[0], w1_ref[...], preferred_element_type=jnp.float32)   # (TM, Cmid_p)
    y = jnp.maximum(acc + bias_ref[...], 0.0)                                    # BN(eval)+ReLU, f32
    z = jnp.dot(y.astype(w2_ref.dtype), w2_ref[...],
                preferred_element_type=jnp.float32)                              # (TM, 4*Cout_p)
    out_ref[0] = (z + b2_ref[...]).astype(out_ref.dtype)


def _round_up(a, m):
    return (a + m - 1) // m * m


def decoder_block_forward(x, params, tile_rows=512):
    """x: (N, Cin, H, W) float32 NCHW (like PyTorch). Returns (N, Cout, 2H-6, 2W-6)."""
    (w_conv, b_conv, gamma, beta, rmean, rvar, w_tconv, b_tconv) = params
    N, Cin, H, W = x.shape
    Cmid = w_conv.shape[0]
    Cout = w_tconv.shape[1]
    eps = 1e-5
    HW = H * W

    # ---- padded / lane-dense sizes -----------------------------------------------------
    K = 9 * Cin
    Kp = _round_up(K, 128)          # reduction dim of matmul 1 (lane axis of x_col)
    Cmid_p = _round_up(Cmid, 128)   # lane-dense BN/ReLU + reduction dim of matmul 2
    Cout_p = _round_up(Cout, 32)    # 4*Cout_p is a multiple of 128 -> dense output stores
    TM = min(_round_up(HW, 8), _round_up(tile_rows, 8))   # rows per grid step (mult of 8)
    HWp = _round_up(HW, TM)
    n_row_tiles = HWp // TM

    # ---- glue: im2col (NCHW -> NHWC, zero-pad 1, gather 3x3 patches) --------------------
    x_nhwc = jnp.transpose(x, (0, 2, 3, 1))
    x_pad = jnp.pad(x_nhwc, ((0, 0), (1, 1), (1, 1), (0, 0)))
    patches = [x_pad[:, dh:dh + H, dw:dw + W, :] for dh in range(3) for dw in range(3)]
    x_col = jnp.concatenate(patches, axis=-1).reshape(N, HW, K)
    x_col = jnp.pad(x_col, ((0, 0), (0, HWp - HW), (0, Kp - K))).astype(jnp.bfloat16)

    # ---- glue: parameter packing --------------------------------------------------------
    scale_vec = gamma / jnp.sqrt(rvar + eps)
    # conv weight (Cmid, Cin, 3, 3) -> (kh, kw, cin, cmid) -> (K, Cmid); fold BN scale in.
    w1 = jnp.transpose(w_conv, (2, 3, 1, 0)).reshape(K, Cmid) * scale_vec[None, :]
    w1 = jnp.pad(w1, ((0, Kp - K), (0, Cmid_p - Cmid))).astype(jnp.bfloat16)
    bias = ((b_conv - rmean) * scale_vec + beta).reshape(1, Cmid)
    bias = jnp.pad(bias, ((0, 0), (0, Cmid_p - Cmid)))
    # tconv weight (Cmid, Cout, 2, 2) -> (cmid, ki, kj, cout), tap-major flattened columns.
    w2 = jnp.transpose(w_tconv, (0, 2, 3, 1))                       # (Cmid, 2, 2, Cout)
    w2 = jnp.pad(w2, ((0, Cmid_p - Cmid), (0, 0), (0, 0), (0, Cout_p - Cout)))
    w2 = w2.reshape(Cmid_p, 4 * Cout_p).astype(jnp.bfloat16)
    b2 = jnp.tile(jnp.pad(b_tconv, (0, Cout_p - Cout)), 4).reshape(1, 4 * Cout_p)

    # ---- per-generation VMEM budget (v7x physical VMEM is only 64 MiB) ------------------
    tile_in = TM * Kp * 2                     # bf16 x_col tile
    tile_out = TM * 4 * Cout_p * 4            # f32 output tile
    weights = Kp * Cmid_p * 2 + Cmid_p * 4 * Cout_p * 2 + Cmid_p * 4 + 4 * Cout_p * 4
    temps = TM * Cmid_p * 4 * 2 + TM * 4 * Cout_p * 4
    needed = 2 * (tile_in + tile_out) + 2 * weights + temps
    vmem_bytes = int(min(48 * 2**20, max(2 * needed, 16 * 2**20)))

    # ---- Pallas kernel: both matmuls + BN/ReLU, one fused lane-dense output -------------
    out = pl.pallas_call(
        _decoder_block_kernel,
        out_shape=jax.ShapeDtypeStruct((N, HWp, 4 * Cout_p), jnp.float32),
        grid_spec=pltpu.PrefetchScalarGridSpec(
            num_scalar_prefetch=0,
            grid=(N, n_row_tiles),
            in_specs=[
                pl.BlockSpec((1, TM, Kp), lambda n, r: (n, r, 0)),
                pl.BlockSpec((Kp, Cmid_p), lambda n, r: (0, 0)),
                pl.BlockSpec((1, Cmid_p), lambda n, r: (0, 0)),
                pl.BlockSpec((Cmid_p, 4 * Cout_p), lambda n, r: (0, 0)),
                pl.BlockSpec((1, 4 * Cout_p), lambda n, r: (0, 0)),
            ],
            out_specs=pl.BlockSpec((1, TM, 4 * Cout_p), lambda n, r: (n, r, 0)),
        ),
        compiler_params=pltpu.CompilerParams(
            dimension_semantics=("parallel", "parallel"),
            vmem_limit_bytes=vmem_bytes,
        ),
    )(x_col, w1, bias, w2, b2)

    # ---- glue: drop padding, interleave 2x2 taps -> (2H, 2W), crop padding=3, to NCHW ---
    z = out[:, :HW, :].reshape(N, H, W, 2, 2, Cout_p)[..., :Cout]   # (n, i, j, ki, kj, o)
    z = jnp.transpose(z, (0, 1, 3, 2, 4, 5)).reshape(N, 2 * H, 2 * W, Cout)
    z = z[:, 3:2 * H - 3, 3:2 * W - 3, :]
    return jnp.transpose(z, (0, 3, 1, 2))


if __name__ == "__main__":
    key = jax.random.PRNGKey(0)
    N, Cin, Cmid, Cout, H, W = 2, 4, 8, 8, 16, 16
    keys = jax.random.split(key, 9)

    x = jax.random.normal(keys[0], (N, Cin, H, W), jnp.float32)

    # deterministic synthetic parameters (PyTorch shapes)
    w_conv = 0.1 * jax.random.normal(keys[1], (Cmid, Cin, 3, 3), jnp.float32)
    b_conv = 0.05 * jax.random.normal(keys[2], (Cmid,), jnp.float32)
    gamma = 1.0 + 0.1 * jax.random.normal(keys[3], (Cmid,), jnp.float32)
    beta = 0.05 * jax.random.normal(keys[4], (Cmid,), jnp.float32)
    rmean = 0.1 * jax.random.normal(keys[5], (Cmid,), jnp.float32)
    rvar = jnp.abs(1.0 + 0.1 * jax.random.normal(keys[6], (Cmid,), jnp.float32))
    w_tconv = 0.1 * jax.random.normal(keys[7], (Cmid, Cout, 2, 2), jnp.float32)
    b_tconv = 0.05 * jax.random.normal(keys[8], (Cout,), jnp.float32)

    params = (w_conv, b_conv, gamma, beta, rmean, rvar, w_tconv, b_tconv)
    out = decoder_block_forward(x, params)
    out = jax.block_until_ready(out)

    # ConvTranspose2d(k=2, s=2, p=3): out spatial = 2*H - 6
    assert out.shape == (N, Cout, 2 * H - 6, 2 * W - 6), out.shape
    assert bool(jnp.all(jnp.isfinite(out)))
    print("KERNEL_OK")
</pallas_src>

<mosaic_0001>
module attributes {stable_mosaic.version = 11 : i64} {
  func.func @_decoder_block_kernel(%arg0: i32, %arg1: i32, %arg2: memref<1x256x128xbf16, #tpu.memory_space<vmem>>, %arg3: memref<128x128xbf16, #tpu.memory_space<vmem>>, %arg4: memref<1x128xf32, #tpu.memory_space<vmem>>, %arg5: memref<128x128xbf16, #tpu.memory_space<vmem>>, %arg6: memref<1x128xf32, #tpu.memory_space<vmem>>, %arg7: memref<1x256x128xf32, #tpu.memory_space<vmem>>) attributes {dimension_semantics = [#tpu.dimension_semantics<parallel>, #tpu.dimension_semantics<parallel>], iteration_bounds = array<i64: 2, 1>, scalar_prefetch = 0 : i64, scratch_operands = 0 : i64, tpu.core_type = #tpu.core_type<tc>, window_params = [{transform_indices = @transform_0, window_bounds = array<i64: 1, 256, 128>}, {pipeline_mode = #tpu.pipeline_mode<synchronous>, transform_indices = @transform_1, window_bounds = array<i64: 128, 128>}, {pipeline_mode = #tpu.pipeline_mode<synchronous>, transform_indices = @transform_2, window_bounds = array<i64: 1, 128>}, {pipeline_mode = #tpu.pipeline_mode<synchronous>, transform_indices = @transform_3, window_bounds = array<i64: 128, 128>}, {pipeline_mode = #tpu.pipeline_mode<synchronous>, transform_indices = @transform_4, window_bounds = array<i64: 1, 128>}, {transform_indices = @transform_5, window_bounds = array<i64: 1, 256, 128>}]} {
    %c0 = arith.constant 0 : index
    %c0_0 = arith.constant 0 : index
    %c0_1 = arith.constant 0 : index
    %0 = vector.load %arg2[%c0, %c0_0, %c0_1] : memref<1x256x128xbf16, #tpu.memory_space<vmem>>, vector<1x256x128xbf16>
    %1 = vector.shape_cast %0 : vector<1x256x128xbf16> to vector<256x128xbf16>
    %c0_2 = arith.constant 0 : index
    %c0_3 = arith.constant 0 : index
    %2 = vector.load %arg3[%c0_2, %c0_3] : memref<128x128xbf16, #tpu.memory_space<vmem>>, vector<128x128xbf16>
    %cst = arith.constant dense<0.000000e+00> : vector<256x128xf32>
    %3 = tpu.matmul %1, %2, %cst {dimension_numbers = #tpu.dot_dimension_numbers<[1], [0], [0], [1], [0, 0, 1, 1], [], []>} : vector<256x128xbf16>, vector<128x128xbf16>, vector<256x128xf32> -> vector<256x128xf32>
    %c0_4 = arith.constant 0 : index
    %c0_5 = arith.constant 0 : index
    %4 = vector.load %arg4[%c0_4, %c0_5] : memref<1x128xf32, #tpu.memory_space<vmem>>, vector<1x128xf32>
    %5 = vector.broadcast %4 : vector<1x128xf32> to vector<256x128xf32>
    %6 = arith.addf %3, %5 : vector<256x128xf32>
    %cst_6 = arith.constant 0.000000e+00 : f32
    %7 = vector.broadcast %cst_6 : f32 to vector<256x128xf32>
    %8 = arith.maximumf %6, %7 : vector<256x128xf32>
    %9 = arith.truncf %8 : vector<256x128xf32> to vector<256x128xbf16>
    %c0_7 = arith.constant 0 : index
    %c0_8 = arith.constant 0 : index
    %10 = vector.load %arg5[%c0_7, %c0_8] : memref<128x128xbf16, #tpu.memory_space<vmem>>, vector<128x128xbf16>
    %cst_9 = arith.constant dense<0.000000e+00> : vector<256x128xf32>
    %11 = tpu.matmul %9, %10, %cst_9 {dimension_numbers = #tpu.dot_dimension_numbers<[1], [0], [0], [1], [0, 0, 1, 1], [], []>} : vector<256x128xbf16>, vector<128x128xbf16>, vector<256x128xf32> -> vector<256x128xf32>
    %c0_10 = arith.constant 0 : index
    %c0_11 = arith.constant 0 : index
    %12 = vector.load %arg6[%c0_10, %c0_11] : memref<1x128xf32, #tpu.memory_space<vmem>>, vector<1x128xf32>
    %13 = vector.broadcast %12 : vector<1x128xf32> to vector<256x128xf32>
    %14 = arith.addf %11, %13 : vector<256x128xf32>
    %c0_12 = arith.constant 0 : index
    %c0_13 = arith.constant 0 : index
    %c0_14 = arith.constant 0 : index
    %15 = vector.load %arg7[%c0_12, %c0_13, %c0_14] : memref<1x256x128xf32, #tpu.memory_space<vmem>>, vector<1x256x128xf32>
    %16 = vector.shape_cast %15 : vector<1x256x128xf32> to vector<256x128xf32>
    %17 = vector.shape_cast %14 : vector<256x128xf32> to vector<1x256x128xf32>
    tpu.vector_store %arg7[%c0_12, %c0_13, %c0_14], %17 {strides = array<i32>} : memref<1x256x128xf32, #tpu.memory_space<vmem>>, vector<1x256x128xf32>,
    return
  }
  func.func @transform_0(%arg0: i32, %arg1: i32) -> (i32, i32, i32) {
    %c0_i32 = arith.constant 0 : i32
    %c0_i32_0 = arith.constant 0 : i32
    return %arg0, %arg1, %c0_i32 : i32, i32, i32
  }
  func.func @transform_1(%arg0: i32, %arg1: i32) -> (i32, i32) {
    %c0_i32 = arith.constant 0 : i32
    %c0_i32_0 = arith.constant 0 : i32
    %c0_i32_1 = arith.constant 0 : i32
    return %c0_i32, %c0_i32_0 : i32, i32
  }
  func.func @transform_2(%arg0: i32, %arg1: i32) -> (i32, i32) {
    %c0_i32 = arith.constant 0 : i32
    %c0_i32_0 = arith.constant 0 : i32
    %c0_i32_1 = arith.constant 0 : i32
    return %c0_i32, %c0_i32_0 : i32, i32
  }
  func.func @transform_3(%arg0: i32, %arg1: i32) -> (i32, i32) {
    %c0_i32 = arith.constant 0 : i32
    %c0_i32_0 = arith.constant 0 : i32
    %c0_i32_1 = arith.constant 0 : i32
    return %c0_i32, %c0_i32_0 : i32, i32
  }
  func.func @transform_4(%arg0: i32, %arg1: i32) -> (i32, i32) {
    %c0_i32 = arith.constant 0 : i32
    %c0_i32_0 = arith.constant 0 : i32
    %c0_i32_1 = arith.constant 0 : i32
    return %c0_i32, %c0_i32_0 : i32, i32
  }
  func.func @transform_5(%arg0: i32, %arg1: i32) -> (i32, i32, i32) {
    %c0_i32 = arith.constant 0 : i32
    %c0_i32_0 = arith.constant 0 : i32
    return %arg0, %arg1, %c0_i32 : i32, i32, i32
  }
}

</mosaic_0001>

<bundles_post_ra>
// kernel: tpu_custom_call.1
= control target key start
LH: loop header
LB: loop body
LE: loop exit
PB: predicated region body
PF: predicated region fallthrough
CT: control target
= control target key end

     0   :  { %10 = vsyncpa [#allocation3], 0  ;;  %s2009_s0 = inlined_call_operand.hbm [shape: bf16[2,256,128], index: 0, kind: input, shape index: {}]   ;;  %s2010_s1 = inlined_call_operand.hbm [shape: bf16[128,128], index: 1, kind: input, shape index: {}]   ;;  %s2011_s2 = inlined_call_operand.vmem [shape: f32[1,128], index: 2, kind: input, shape index: {}]   ;;  %s2012_s3 = inlined_call_operand.hbm [shape: bf16[128,128], index: 3, kind: input, shape index: {}]   ;;  %s2013_s4 = inlined_call_operand.vmem [shape: f32[1,128], index: 4, kind: input, shape index: {}]   ;;  %s2014_s5 = inlined_call_operand.hbm [shape: f32[2,256,128], index: 5, kind: output, shape index: {}]  }
   0x1   :  { %12 = vsyncpa [#allocation3 + $0x1], 0 }
   0x2   :  { %13 = vsyncpa [#allocation6], 0 }
   0x3   :  { %14 = vsyncpa [#allocation4], 0 }
   0x4   :  { %16 = vsyncpa [#allocation4 + $0x1], 0  ;;  %s1617_s18 = smov 0   ;;  %s1619_s19 = smov 0  }
   0x5   :  { %s1621_s20 = smov 0   ;;  %s1623_s21 = smov 0  }
   0x6   :  { %s1625_s22 = smov 0   ;;  %s1627_s23 = smov 0  }
   0x7 LB: > { %s1087_s24 = sadd.s32 4294967295, %s1577_s23   ;;  %s1088_s25 = sadd.s32 4294967294, %s1577_s23   ;;  %s1577_s23 = sphi %s1627_s23, %s22_s23   ;;  %s1573_s22 = sphi %s1625_s22, %s2038_s22   ;;  %s1569_s21 = sphi %s1623_s21, %s2037_s21   ;;  %s1565_s20 = sphi %s1621_s20, %s2036_s20   ;;  %s1561_s19 = sphi %s1619_s19, %s2035_s19   ;;  %s1557_s18 = sphi %s1617_s18, %s2034_s18  }
   0x8   : > { %p56_p0 = scmp.ne.s32.totalorder %s1561_s19, %s1557_s18  ;;  %p1651_p1 = scmp.eq.s32.totalorder %s1087_s24, 0 }
   0x9   : > { %p1655_p2 = scmp.eq.s32.totalorder %s1087_s24, 1  ;;  %p172_p3 = scmp.eq.s32.totalorder %s1088_s25, 1 }
   0xa   : > { %s2020_s26 = scalar_select %p1651_p1, 1, 0 }
   0xb   : > { %p1661_p4 = por %p1651_p1, %p56_p0  ;;  %p1089_p5 = scmp.ge.s32.totalorder %s1577_s23, 1 }
   0xc   : > { %p1666_p6 = por %p172_p3, %p56_p0  ;;  %p179_p7 = scmp.lt.s32.totalorder %s1577_s23, 3 }
   0xd   : > { %s2022_s28 = scalar_select %p1661_p4, 1, 0 }
   0xe   : > { %s2023_s29 = scalar_select %p1666_p6, 1, 0 }
   0xf   : > { %p1671_p8 = pnand %p1089_p5, %p179_p7  ;;  %s1579_s6 = smov [#allocation5]  }
  0x10   : > { %s191_s7 = sshll.u32 %s1579_s6, 4  ;;  %s1580_s9 = smov [#allocation7]   ;;  %s1675_s7 = int_to_ptr.vmem [resolvable:$true] %s191_s7 }
  0x11   : > { %p1298_p9 = pneg %p1671_p8  ;;  %s207_s10 = sshll.u32 %s1580_s9, 4  ;;  %s1686_s10 = int_to_ptr.vmem [resolvable:$true] %s207_s10 }
  0x12   : > { %s1405_s13 = scalar_lea.hbm %s2010_s1, 1024 }
  0x13   : > { %p1682_p11 = pnand %p1298_p9, %p1651_p1  ;;  %p1406_p12 = scmp.ne.s32.totalorder %s2010_s1, %s1405_s13 }
  0x14   : > { %p1412_p5 = scmp.lt.u32.totalorder %s1405_s13, %s2010_s1 }
  0x15   : > { %p1407_p13 = pneg %p1682_p11 }
  0x17   : > { %p1408_p0 = pnand %p1407_p13, %p1406_p12 }
  0x19   : > { %p1409_p3 = pneg %p1408_p0 }
  0x1b   : > { %p1414_p7 = pnand %p1412_p5, %p1409_p3 }
  0x1d   : > { %1417 = shalt.err (!%p1414_p7)
}
  0x1e   : > { %s1418_s24 = scalar_lea.vmem %s1675_s7, 1024  ;;  %p1426_p1 = scmp.lt.s32.totalorder %s1675_s7, %s1675_s7 }
  0x1f   : > { %p1419_p9 = scmp.ne.s32.totalorder %s1675_s7, %s1418_s24  ;;  %p1427_p12 = scmp.lt.s32.totalorder %s1418_s24, %s1418_s24 }
  0x21   : > { %p1421_p10 = pnand %p1419_p9, %p1407_p13  ;;  %p1428_p0 = por %p1427_p12, %p1426_p1 }
  0x23   : > { %p1422_p6 = pneg %p1421_p10 }
  0x25   : > { %p1429_p4 = pnand %p1428_p0, %p1422_p6 }
  0x27   : > { %1432 = shalt.err (!%p1429_p4)
}
  0x28   : > { %s2018_s25 = smov 64   ;;  %s1582_s6 = smov 4  }
  0x29   : > { %1301 = dma.hbm_to_vmem [thread:$0]  (!%p1682_p11), %s2010_s1, 1024, %s1675_s7, [#allocation6], %s2018_s25, %s2018_s25, %s1582_s6  }
  0x2a   : > { %s1433_s14 = scalar_lea.hbm %s2012_s3, 1024 }
  0x2b   : > { %p1434_p1 = scmp.ne.s32.totalorder %s2012_s3, %s1433_s14  ;;  %p1440_p10 = scmp.lt.u32.totalorder %s1433_s14, %s2012_s3 }
  0x2d   : > { %p1436_p4 = pnand %p1434_p1, %p1407_p13 }
  0x2f   : > { %p1437_p6 = pneg %p1436_p4 }
  0x31   : > { %p1442_p3 = pnand %p1440_p10, %p1437_p6 }
  0x33   : > { %1445 = shalt.err (!%p1442_p3)
}
  0x34   : > { %s1446_s7 = scalar_lea.vmem %s1686_s10, 1024  ;;  %p1454_p12 = scmp.lt.s32.totalorder %s1686_s10, %s1686_s10 }
  0x35   : > { %p1447_p5 = scmp.ne.s32.totalorder %s1686_s10, %s1446_s7  ;;  %p1455_p0 = scmp.lt.s32.totalorder %s1446_s7, %s1446_s7 }
  0x37   : > { %p1449_p7 = pnand %p1447_p5, %p1407_p13  ;;  %p1456_p1 = por %p1455_p0, %p1454_p12 }
  0x39   : > { %p1450_p9 = pneg %p1449_p7 }
  0x3b   : > { %p1457_p4 = pnand %p1456_p1, %p1450_p9 }
  0x3d   : > { %1460 = shalt.err (!%p1457_p4)
}
  0x3e   : > { %1304 = dma.hbm_to_vmem [thread:$0]  (!%p1682_p11), %s2012_s3, 1024, %s1686_s10, [#allocation6], %s2018_s25, %s2018_s25, %s1582_s6  }
  0x3f   : > { %s34_s8 = sadd.s32 1, %s1573_s22  ;;  %s43_s12 = sadd.s32 1, %s1565_s20 }
  0x40   : > { %p36_p13 = scmp.ge.s32.totalorder %s34_s8, 2  ;;  %p50_p6 = scmp.ne.s32.totalorder %s1565_s20, %s1561_s19 }
  0x41   : > { %p51_p10 = scmp.eq.s32.totalorder %s1577_s23, 0  ;;  %p1315_p3 = scmp.lt.s32.totalorder %s1577_s23, 2 }
  0x42   : > { %s2040_s8 = smov (%p36_p13, %s34_s8), 0  ;;  %p1756_p7 = por %p1655_p2, %p50_p6 }
  0x43   : > { %p52_p5 = por %p51_p10, %p50_p6  ;;  %s38_s14 = ssub.s32 %s1573_s22, %s2040_s8 }
  0x44   : > { %s2026_s13 = scalar_select %p1756_p7, 1, 0 }
  0x45   : > { %s224_s15 = sand.u32 1, %s1565_s20   ;;  %p41_p9 = scmp.eq.s32.totalorder %s38_s14, 0 }
  0x46   : > { %s1093_s10 = sshll.u32 %s224_s15, 7  ;;  %s1140_s16 = sshll.u32 %s1573_s22, 11 }
  0x47   : > { %s1765_s17 = scalar_select %p41_p9, %s1565_s20, %s43_s12  }
  0x48   : > { %s1770_s9 = scalar_lea.hbm %s2009_s0, %s1140_s16  ;;  %s228_s27 = scalar_lea.vmem [#allocation2], %s1093_s10 }
  0x49   : > { %s237_s11 = sshll.u32 %s228_s27, 4  ;;  %p1774_p2 = pnand %p1315_p3, %p52_p5  ;;  %s1778_s11 = int_to_ptr.vmem [resolvable:$true] %s237_s11 }
  0x4a   : > { %s1780_s12 = scalar_lea.sflag [#allocation3], %s224_s15  ;;  %s1461_s14 = scalar_lea.hbm %s1770_s9, 2048 }
  0x4b   : > { %p1462_p11 = scmp.ne.s32.totalorder %s1770_s9, %s1461_s14  ;;  %p1463_p12 = pneg %p1774_p2 }
  0x4c   : > { %s1466_s24 = scalar_lea.hbm %s2009_s0, 4096  ;;  %p1467_p4 = scmp.lt.u32.totalorder %s1770_s9, %s2009_s0 }
  0x4d   : > { %p1464_p0 = pnand %p1463_p12, %p1462_p11  ;;  %p1468_p13 = scmp.lt.u32.totalorder %s1466_s24, %s1461_s14 }
  0x4e   : > { %p1470_p10 = scmp.lt.u32.totalorder %s1461_s14, %s1770_s9 }
  0x4f   : > { %p1465_p1 = pneg %p1464_p0  ;;  %p1469_p6 = por %p1468_p13, %p1467_p4 }
  0x51   : > { %p1471_p3 = por %p1470_p10, %p1469_p6 }
  0x53   : > { %p1472_p5 = pnand %p1471_p3, %p1465_p1 }
  0x55   : > { %1475 = shalt.err (!%p1472_p5)
}
  0x56   : > { %s1476_s15 = scalar_lea.vmem %s1778_s11, 2048  ;;  %s1583_s10 = smov [#allocation2]  }
  0x57   : > { %p1477_p9 = scmp.ne.s32.totalorder %s1778_s11, %s1476_s15  ;;  %s1481_s16 = sshll.u32 %s1583_s10, 4  ;;  %s1482_s16 = int_to_ptr.vmem [resolvable:$false] %s1481_s16 }
  0x58   : > { %s1483_s7 = scalar_lea.vmem %s1482_s16, 4096  ;;  %p1484_p7 = scmp.lt.s32.totalorder %s1778_s11, %s1482_s16 }
  0x59   : > { %p1479_p11 = pnand %p1477_p9, %p1463_p12  ;;  %p1485_p4 = scmp.lt.s32.totalorder %s1483_s7, %s1476_s15 }
  0x5b   : > { %p1480_p0 = pneg %p1479_p11  ;;  %p1486_p13 = por %p1485_p4, %p1484_p7 }
  0x5d   : > { %p1487_p6 = pnand %p1486_p13, %p1480_p0 }
  0x5f   : > { %1490 = shalt.err (!%p1487_p6)
}
  0x60   : > { %s2028_s14 = smov 64   ;;  %249 = sbr.rel (%p1671_p8) target bundleno = 650 (0x28a), region = 40 }
  0x61   : > { %1308 = dma.hbm_to_vmem [thread:$0]  (!%p1774_p2), %s1770_s9, 2048, %s1778_s11, %s1780_s12, %s2028_s14, %s2028_s14, %s1582_s6  }
  0x62   : > { %s1814_s24 = sand.u32 (!%p1671_p8), 1, %s1561_s19   ;;  %p2029_p7 = scmp.ne.s32.totalorder (!%p1671_p8), %s2022_s28, 0 }
  0x63   : > { %s1097_s27 = sshll.u32 (!%p1671_p8), %s1814_s24, 7  ;;  %s252_s15 = scalar_lea.sflag (!%p1671_p8), [#allocation3], %s1814_s24 }
  0x64   : > { %s1818_s10 = scalar_lea.vmem (!%p1671_p8), [#allocation2], %s1097_s27 }
  0x67   : > { %1544 = dma.done.wait (%p2029_p7), %s252_s15, 2048  }
  0x68   : > { %1546 = vsyncadd (%p2029_p7), %s252_s15, 4294965248  ;;  %p2030_p2 = scmp.ne.s32.totalorder %s2020_s26, 0 }
  0x6a   : > { %1548 = dma.done.wait (%p2030_p2), [#allocation6], 2048  }
  0x6b   : > { %1550 = vsyncadd (%p2030_p2), [#allocation6], 4294965248  ;;  %v1373_v0 = vld [vmem:[#allocation5] sm:$0xff]   ;;  %v1374_v1 = vld [vmem:[#allocation5 + $0x8] sm:$0xff]   ;;  %s1100_s30 = sshll.u32 %s1814_s24, 8  ;;  %s1141_s11 = sshll.u32 %s1569_s21, 12 }
  0x6c   : > { %1190 = vmatprep.subr.bf16.mxu0 %v1373_v0  ;;  %v1375_v2 = vld [vmem:[#allocation5 + $0x10] sm:$0xff]   ;;  %v1376_v3 = vld [vmem:[#allocation5 + $0x18] sm:$0xff]   ;;  %v1381_v4 = vld [vmem:[%s1818_s10] sm:$0xff]   ;;  %s1889_s9 = scalar_lea.vmem [#allocation8], %s1100_s30  ;;  %s1954_s14 = scalar_lea.hbm %s2014_s5, %s1141_s11 }
  0x6d   : > { %1191 = vmatpush3.bf16.msra.mxu0 %v1373_v0  ;;  %1206 = vmatprep.mubr.bf16.mxu0 %v1381_v4  ;;  %v1377_v5 = vld [vmem:[#allocation5 + $0x20] sm:$0xff]   ;;  %v1378_v6 = vld [vmem:[#allocation5 + $0x28] sm:$0xff]   ;;  %v1379_v7 = vld [vmem:[#allocation5 + $0x30] sm:$0xff]   ;;  %s981_s12 = sshll.u32 %s1889_s9, 4  ;;  %s966_s21 = scalar_lea.sflag [#allocation4], %s1814_s24  ;;  %s1956_s12 = int_to_ptr.vmem [resolvable:$true] %s981_s12 }
  0x6e   : > { %1192 = vmatprep.subr.bf16.mxu0 %v1374_v1  ;;  %v1380_v8 = vld [vmem:[#allocation5 + $0x38] sm:$0xff]   ;;  %v1397_v9 = vld [vmem:[#allocation7] sm:$0xff]   ;;  %v1398_v10 = vld [vmem:[#allocation7 + $0x8] sm:$0xff]   ;;  %s1491_s27 = scalar_lea.vmem %s1956_s12, 4096  ;;  %p2031_p12 = scmp.ne.s32.totalorder %s2026_s13, 0 }
  0x6f   : > { %1238 = vmatprep.subr.bf16.mxu1 %v1397_v9  ;;  %v1399_v11 = vld [vmem:[#allocation7 + $0x10] sm:$0xff]   ;;  %v1382_v12 = vld [vmem:[%s1818_s10 + $0x8] sm:$0xff]   ;;  %v1400_v14 = vld [vmem:[#allocation7 + $0x18] sm:$0xff]   ;;  %p1492_p8 = scmp.ne.s32.totalorder %s1956_s12, %s1491_s27  ;;  %s1584_s15 = smov [#allocation8]  }
  0x70   : > { %1239 = vmatpush3.bf16.msra.mxu1 %v1397_v9  ;;  %v1383_v13 = vld [vmem:[%s1818_s10 + $0x10] sm:$0xff]   ;;  %v1401_v15 = vld [vmem:[#allocation7 + $0x20] sm:$0xff]   ;;  %v1384_v16 = vld [vmem:[%s1818_s10 + $0x18] sm:$0xff]  }
  0x71   : > { %1193 = vmatpush3.bf16.msra.mxu0 %v1374_v1  ;;  %1240 = vmatprep.subr.bf16.mxu1 %v1398_v10  ;;  %v1385_v17 = vld [vmem:[%s1818_s10 + $0x20] sm:$0xff]   ;;  %v1402_v18 = vld [vmem:[#allocation7 + $0x28] sm:$0xff]   ;;  %v1387_v20 = vld [vmem:[%s1818_s10 + $0x30] sm:$0xff]   ;;  %p1493_p1 = pnand %p1492_p8, %p2031_p12 }
  0x72   : > { %1194 = vmatprep.subr.bf16.mxu0 %v1375_v2  ;;  %v1386_v19 = vld [vmem:[%s1818_s10 + $0x28] sm:$0xff]   ;;  %v1388_v21 = vld [vmem:[%s1818_s10 + $0x38] sm:$0xff]   ;;  %v1389_v22 = vld [vmem:[%s1818_s10 + $0x40] sm:$0xff]  }
  0x73   : > { %v1390_v23 = vld [vmem:[%s1818_s10 + $0x48] sm:$0xff]   ;;  %v1391_v24 = vld [vmem:[%s1818_s10 + $0x50] sm:$0xff]   ;;  %v1392_v25 = vld [vmem:[%s1818_s10 + $0x58] sm:$0xff]   ;;  %p1494_p10 = pneg %p1493_p1 }
  0x74   : > { %1241 = vmatpush3.bf16.msra.mxu1 %v1398_v10  ;;  %v1393_v26 = vld [vmem:[%s1818_s10 + $0x60] sm:$0xff]   ;;  %v1394_v27 = vld [vmem:[%s1818_s10 + $0x68] sm:$0xff]   ;;  %v1395_v28 = vld [vmem:[%s1818_s10 + $0x70] sm:$0xff]  }
  0x75   : > { %1195 = vmatpush3.bf16.msra.mxu0 %v1375_v2  ;;  %1242 = vmatprep.subr.bf16.mxu1 %v1399_v11  ;;  %v1396_v29 = vld [vmem:[%s1818_s10 + $0x78] sm:$0xff]   ;;  %v1403_v30 = vld [vmem:[#allocation7 + $0x30] sm:$0xff]   ;;  %v1847_v32 = vld [vmem:[%s2011_s2] ss:$0 sm:$0xff]  ;;  %s1495_s10 = sshll.u32 %s1584_s15, 4  ;;  %s1496_s10 = int_to_ptr.vmem [resolvable:$false] %s1495_s10 }
  0x76   : > { %1196 = vmatprep.subr.bf16.mxu0 %v1376_v3  ;;  %v1404_v31 = vld [vmem:[#allocation7 + $0x38] sm:$0xff]   ;;  %s1497_s26 = scalar_lea.vmem %s1496_s10, 8192  ;;  %p1498_p3 = scmp.lt.s32.totalorder %s1956_s12, %s1496_s10 }
  0x77   : > { %p1499_p5 = scmp.lt.s32.totalorder %s1497_s26, %s1491_s27 }
  0x78   : > { %1243 = vmatpush3.bf16.msra.mxu1 %v1399_v11 }
  0x79   : > { %1197 = vmatpush3.bf16.msra.mxu0 %v1376_v3  ;;  %1244 = vmatprep.subr.bf16.mxu1 %v1400_v14  ;;  %p1500_p9 = por %p1499_p5, %p1498_p3 }
  0x7a   : > { %1198 = vmatprep.subr.bf16.mxu0 %v1377_v5 }
  0x7b   : > { %p1501_p11 = pnand %p1500_p9, %p1494_p10 }
  0x7c   : > { %1245 = vmatpush3.bf16.msra.mxu1 %v1400_v14 }
  0x7d   : > { %1199 = vmatpush3.bf16.msra.mxu0 %v1377_v5  ;;  %1246 = vmatprep.subr.bf16.mxu1 %v1401_v15 }
  0x7e   : > { %1200 = vmatprep.subr.bf16.mxu0 %v1378_v6 }
  0x80   : > { %1247 = vmatpush3.bf16.msra.mxu1 %v1401_v15 }
  0x81   : > { %1201 = vmatpush3.bf16.msra.mxu0 %v1378_v6  ;;  %1248 = vmatprep.subr.bf16.mxu1 %v1402_v18 }
  0x82   : > { %1202 = vmatprep.subr.bf16.mxu0 %v1379_v7 }
  0x84   : > { %1249 = vmatpush3.bf16.msra.mxu1 %v1402_v18 }
  0x85   : > { %1203 = vmatpush3.bf16.msra.mxu0 %v1379_v7  ;;  %1250 = vmatprep.subr.bf16.mxu1 %v1403_v30 }
  0x86   : > { %1204 = vmatprep.subr.bf16.mxu0 %v1380_v8 }
  0x88   : > { %1251 = vmatpush3.bf16.msra.mxu1 %v1403_v30 }
  0x89   : > { %1205 = vmatpush3.bf16.msra.mxu0 %v1380_v8  ;;  %1252 = vmatprep.subr.bf16.mxu1 %v1404_v31 }
  0x8c   : > { %1207 = vmatmul.mubr.bf16.vlgmr.msra.gmra.mrb[0].mxu0 %v1382_v12  ;;  %1253 = vmatpush3.bf16.msra.mxu1 %v1404_v31 }
  0x8d   : > { %1210 = vmatprep.mubr.bf16.mxu0 %v1383_v13 }
  0x94   : > { %1211 = vmatmul.mubr.bf16.gmra.mrb[4].mxu0 %v1384_v16 }
  0x95   : > { %1214 = vmatprep.mubr.bf16.mxu0 %v1385_v17 }
  0x9c   : > { %1215 = vmatmul.mubr.bf16.gmra.mrb[8].mxu0 %v1386_v19 }
  0x9d   : > { %1218 = vmatprep.mubr.bf16.mxu0 %v1387_v20 }
  0xa4   : > { %1219 = vmatmul.mubr.bf16.gmra.mrb[12].mxu0 %v1388_v21 }
  0xa5   : > { %1222 = vmatprep.mubr.bf16.mxu0 %v1389_v22 }
  0xac   : > { %1223 = vmatmul.mubr.bf16.gmra.mrb[16].mxu0 %v1390_v23 }
  0xad   : > { %1226 = vmatprep.mubr.bf16.mxu0 %v1391_v24 }
  0xb4   : > { %1227 = vmatmul.mubr.bf16.gmra.mrb[20].mxu0 %v1392_v25 }
  0xb5   : > { %1230 = vmatprep.mubr.bf16.mxu0 %v1393_v26 }
  0xbc   : > { %1231 = vmatmul.mubr.bf16.gmra.mrb[24].mxu0 %v1394_v27 }
  0xbd   : > { %1234 = vmatprep.mubr.bf16.mxu0 %v1395_v28 }
  0xc4   : > { %1235 = vmatmul.mubr.bf16.gmra.mrb[28].mxu0 %v1396_v29 }
 0x15f   : > { %v1208_v33 = vpop.f32.mrb[0].mxu0 }
 0x160   : > { %v535_v34 = vadd.f32 %v1208_v33, %v1847_v32  ;;  %v526_v35 = vpop.f32.mrb[1].mxu0 }
 0x161   : > { %v527_v36 = vadd.f32 %v1847_v32, %v526_v35  ;;  %v1209_v37 = vpop.f32.mrb[2].mxu0 }
 0x162   : > { %v538_v38 = vadd.f32 %v1209_v37, %v1847_v32  ;;  %v529_v39 = vpop.f32.mrb[3].mxu0  ;;  %v655_v41 = vmax.f32 %v535_v34, 0.0 }
 0x163   : > { %v530_v40 = vadd.f32 %v1847_v32, %v529_v39  ;;  %v653_v43 = vmax.f32 %v527_v36, 0.0 }
 0x164   : > { %v656_v42 = vmax.f32 %v538_v38, 0.0 }
 0x165   : > { %v654_v44 = vmax.f32 %v530_v40, 0.0 }
 0x166   : > { %v686_v45 = vpack.c.bf16 %v656_v42, %v655_v41 }
 0x167   : > { %v1212_v46 = vpop.f32.mrb[4].mxu0  ;;  %v685_v47 = vpack.c.bf16 %v654_v44, %v653_v43 }
 0x168   : > { %v551_v48 = vadd.f32 %v1212_v46, %v1847_v32  ;;  %v542_v49 = vpop.f32.mrb[5].mxu0 }
 0x169   : > { %v543_v50 = vadd.f32 %v1847_v32, %v542_v49  ;;  %v1213_v51 = vpop.f32.mrb[6].mxu0  ;;  %1254 = vmatprep.mubr.bf16.mxu1 %v685_v47 }
 0x16a   : > { %v554_v52 = vadd.f32 %v1213_v51, %v1847_v32  ;;  %v545_v53 = vpop.f32.mrb[7].mxu0  ;;  %1255 = vmatmul.mubr.bf16.vlgmr.msra.gmra.mrb[0].mxu1 %v686_v45  ;;  %v659_v55 = vmax.f32 %v551_v48, 0.0 }
 0x16b   : > { %v546_v54 = vadd.f32 %v1847_v32, %v545_v53  ;;  %v657_v57 = vmax.f32 %v543_v50, 0.0 }
 0x16c   : > { %v660_v56 = vmax.f32 %v554_v52, 0.0 }
 0x16d   : > { %v658_v58 = vmax.f32 %v546_v54, 0.0 }
 0x16e   : > { %v688_v59 = vpack.c.bf16 %v660_v56, %v659_v55 }
 0x16f   : > { %v687_v60 = vpack.c.bf16 %v658_v58, %v657_v57  ;;  %v1216_v61 = vpop.f32.mrb[8].mxu0 }
 0x170   : > { %v567_v62 = vadd.f32 %v1216_v61, %v1847_v32  ;;  %v558_v63 = vpop.f32.mrb[9].mxu0 }
 0x171   : > { %v559_v0 = vadd.f32 %v1847_v32, %v558_v63  ;;  %v1217_v1 = vpop.f32.mrb[10].mxu0  ;;  %1258 = vmatprep.mubr.bf16.mxu1 %v687_v60 }
 0x172   : > { %v570_v2 = vadd.f32 %v1217_v1, %v1847_v32  ;;  %v561_v3 = vpop.f32.mrb[11].mxu0  ;;  %1259 = vmatmul.mubr.bf16.gmra.mrb[4].mxu1 %v688_v59  ;;  %v663_v5 = vmax.f32 %v567_v62, 0.0 }
 0x173   : > { %v562_v4 = vadd.f32 %v1847_v32, %v561_v3  ;;  %v661_v7 = vmax.f32 %v559_v0, 0.0 }
 0x174   : > { %v664_v6 = vmax.f32 %v570_v2, 0.0 }
 0x175   : > { %v662_v8 = vmax.f32 %v562_v4, 0.0 }
 0x176   : > { %v690_v9 = vpack.c.bf16 %v664_v6, %v663_v5 }
 0x177   : > { %v689_v10 = vpack.c.bf16 %v662_v8, %v661_v7  ;;  %v1220_v11 = vpop.f32.mrb[12].mxu0 }
 0x178   : > { %v583_v12 = vadd.f32 %v1220_v11, %v1847_v32  ;;  %v574_v13 = vpop.f32.mrb[13].mxu0 }
 0x179   : > { %v575_v14 = vadd.f32 %v1847_v32, %v574_v13  ;;  %v1221_v15 = vpop.f32.mrb[14].mxu0  ;;  %1262 = vmatprep.mubr.bf16.mxu1 %v689_v10 }
 0x17a   : > { %v586_v16 = vadd.f32 %v1221_v15, %v1847_v32  ;;  %v577_v17 = vpop.f32.mrb[15].mxu0  ;;  %1263 = vmatmul.mubr.bf16.gmra.mrb[8].mxu1 %v690_v9  ;;  %v667_v19 = vmax.f32 %v583_v12, 0.0 }
 0x17b   : > { %v578_v18 = vadd.f32 %v1847_v32, %v577_v17  ;;  %v665_v21 = vmax.f32 %v575_v14, 0.0 }
 0x17c   : > { %v668_v20 = vmax.f32 %v586_v16, 0.0 }
 0x17d   : > { %v666_v22 = vmax.f32 %v578_v18, 0.0  ;;  %v1885_v18 = vld [vmem:[%s2013_s4] ss:$0 sm:$0xff] }
 0x17e   : > { %v692_v23 = vpack.c.bf16 %v668_v20, %v667_v19 }
 0x17f   : > { %v691_v24 = vpack.c.bf16 %v666_v22, %v665_v21  ;;  %v1224_v25 = vpop.f32.mrb[16].mxu0 }
 0x180   : > { %v599_v26 = vadd.f32 %v1224_v25, %v1847_v32  ;;  %v590_v27 = vpop.f32.mrb[17].mxu0 }
 0x181   : > { %v591_v28 = vadd.f32 %v1847_v32, %v590_v27  ;;  %v1225_v29 = vpop.f32.mrb[18].mxu0  ;;  %1266 = vmatprep.mubr.bf16.mxu1 %v691_v24 }
 0x182   : > { %v602_v30 = vadd.f32 %v1225_v29, %v1847_v32  ;;  %v593_v31 = vpop.f32.mrb[19].mxu0  ;;  %1267 = vmatmul.mubr.bf16.gmra.mrb[12].mxu1 %v692_v23  ;;  %v671_v34 = vmax.f32 %v599_v26, 0.0 }
 0x183   : > { %v594_v33 = vadd.f32 %v1847_v32, %v593_v31  ;;  %v669_v36 = vmax.f32 %v591_v28, 0.0 }
 0x184   : > { %v672_v35 = vmax.f32 %v602_v30, 0.0 }
 0x185   : > { %v670_v37 = vmax.f32 %v594_v33, 0.0 }
 0x186   : > { %v694_v38 = vpack.c.bf16 %v672_v35, %v671_v34 }
 0x187   : > { %v693_v39 = vpack.c.bf16 %v670_v37, %v669_v36  ;;  %v1228_v40 = vpop.f32.mrb[20].mxu0 }
 0x188   : > { %v615_v41 = vadd.f32 %v1228_v40, %v1847_v32  ;;  %v606_v42 = vpop.f32.mrb[21].mxu0 }
 0x189   : > { %v607_v43 = vadd.f32 %v1847_v32, %v606_v42  ;;  %v1229_v44 = vpop.f32.mrb[22].mxu0  ;;  %1270 = vmatprep.mubr.bf16.mxu1 %v693_v39 }
 0x18a   : > { %v618_v45 = vadd.f32 %v1229_v44, %v1847_v32  ;;  %v609_v46 = vpop.f32.mrb[23].mxu0  ;;  %1271 = vmatmul.mubr.bf16.gmra.mrb[16].mxu1 %v694_v38  ;;  %v675_v48 = vmax.f32 %v615_v41, 0.0 }
 0x18b   : > { %v610_v47 = vadd.f32 %v1847_v32, %v609_v46  ;;  %v673_v50 = vmax.f32 %v607_v43, 0.0 }
 0x18c   : > { %v676_v49 = vmax.f32 %v618_v45, 0.0 }
 0x18d   : > { %v674_v51 = vmax.f32 %v610_v47, 0.0 }
 0x18e   : > { %v696_v52 = vpack.c.bf16 %v676_v49, %v675_v48 }
 0x18f   : > { %v695_v53 = vpack.c.bf16 %v674_v51, %v673_v50  ;;  %v1232_v54 = vpop.f32.mrb[24].mxu0 }
 0x190   : > { %v631_v55 = vadd.f32 %v1232_v54, %v1847_v32  ;;  %v622_v56 = vpop.f32.mrb[25].mxu0 }
 0x191   : > { %v623_v57 = vadd.f32 %v1847_v32, %v622_v56  ;;  %v1233_v58 = vpop.f32.mrb[26].mxu0  ;;  %1274 = vmatprep.mubr.bf16.mxu1 %v695_v53 }
 0x192   : > { %v634_v59 = vadd.f32 %v1233_v58, %v1847_v32  ;;  %v625_v60 = vpop.f32.mrb[27].mxu0  ;;  %1275 = vmatmul.mubr.bf16.gmra.mrb[20].mxu1 %v696_v52  ;;  %v679_v62 = vmax.f32 %v631_v55, 0.0 }
 0x193   : > { %v626_v61 = vadd.f32 %v1847_v32, %v625_v60  ;;  %v677_v0 = vmax.f32 %v623_v57, 0.0 }
 0x194   : > { %v680_v63 = vmax.f32 %v634_v59, 0.0 }
 0x195   : > { %v678_v1 = vmax.f32 %v626_v61, 0.0 }
 0x196   : > { %v698_v2 = vpack.c.bf16 %v680_v63, %v679_v62 }
 0x197   : > { %v697_v3 = vpack.c.bf16 %v678_v1, %v677_v0  ;;  %v1236_v4 = vpop.f32.mrb[28].mxu0 }
 0x198   : > { %v647_v5 = vadd.f32 %v1236_v4, %v1847_v32  ;;  %v638_v6 = vpop.f32.mrb[29].mxu0 }
 0x199   : > { %v639_v7 = vadd.f32 %v1847_v32, %v638_v6  ;;  %v1237_v8 = vpop.f32.mrb[30].mxu0  ;;  %1278 = vmatprep.mubr.bf16.mxu1 %v697_v3 }
 0x19a   : > { %v650_v9 = vadd.f32 %v1237_v8, %v1847_v32  ;;  %v641_v10 = vpop.f32.mrb[31].mxu0  ;;  %1279 = vmatmul.mubr.bf16.gmra.mrb[24].mxu1 %v698_v2  ;;  %v683_v12 = vmax.f32 %v647_v5, 0.0 }
 0x19b   : > { %v642_v11 = vadd.f32 %v1847_v32, %v641_v10  ;;  %v681_v14 = vmax.f32 %v639_v7, 0.0 }
 0x19c   : > { %v684_v13 = vmax.f32 %v650_v9, 0.0 }
 0x19d   : > { %v682_v15 = vmax.f32 %v642_v11, 0.0 }
 0x19e   : > { %v700_v16 = vpack.c.bf16 %v684_v13, %v683_v12 }
 0x19f   : > { %v699_v17 = vpack.c.bf16 %v682_v15, %v681_v14 }
 0x1a1   : > { %1282 = vmatprep.mubr.bf16.mxu1 %v699_v17 }
 0x1a2   : > { %1283 = vmatmul.mubr.bf16.gmra.mrb[28].mxu1 %v700_v16 }
 0x23d   : > { %v1256_v19 = vpop.f32.mrb[0].mxu1 }
 0x23e   : > { %v815_v20 = vadd.f32 %v1256_v19, %v1885_v18  ;;  %v806_v21 = vpop.f32.mrb[1].mxu1 }
 0x23f   : > { %v807_v32 = vadd.f32 %v1885_v18, %v806_v21  ;;  %v1257_v22 = vpop.f32.mrb[2].mxu1 }
 0x240   : > { %935 = vst [vmem:[%s1889_s9 + $0x10] sm:$0xff] %v815_v20  ;;  %v818_v23 = vadd.f32 %v1257_v22, %v1885_v18  ;;  %v809_v24 = vpop.f32.mrb[3].mxu1 }
 0x241   : > { %933 = vst [vmem:[%s1889_s9] sm:$0xff] %v807_v32  ;;  %v810_v25 = vadd.f32 %v1885_v18, %v809_v24 }
 0x242   : > { %936 = vst [vmem:[%s1889_s9 + $0x18] sm:$0xff] %v818_v23 }
 0x243   : > { %934 = vst [vmem:[%s1889_s9 + $0x8] sm:$0xff] %v810_v25 }
 0x245   : > { %v1260_v26 = vpop.f32.mrb[4].mxu1 }
 0x246   : > { %v831_v27 = vadd.f32 %v1260_v26, %v1885_v18  ;;  %v822_v28 = vpop.f32.mrb[5].mxu1 }
 0x247   : > { %v823_v29 = vadd.f32 %v1885_v18, %v822_v28  ;;  %v1261_v30 = vpop.f32.mrb[6].mxu1 }
 0x248   : > { %939 = vst [vmem:[%s1889_s9 + $0x30] sm:$0xff] %v831_v27  ;;  %v834_v31 = vadd.f32 %v1261_v30, %v1885_v18  ;;  %v825_v33 = vpop.f32.mrb[7].mxu1 }
 0x249   : > { %937 = vst [vmem:[%s1889_s9 + $0x20] sm:$0xff] %v823_v29  ;;  %v826_v34 = vadd.f32 %v1885_v18, %v825_v33 }
 0x24a   : > { %940 = vst [vmem:[%s1889_s9 + $0x38] sm:$0xff] %v834_v31 }
 0x24b   : > { %938 = vst [vmem:[%s1889_s9 + $0x28] sm:$0xff] %v826_v34 }
 0x24d   : > { %v1264_v35 = vpop.f32.mrb[8].mxu1 }
 0x24e   : > { %v847_v36 = vadd.f32 %v1264_v35, %v1885_v18  ;;  %v838_v37 = vpop.f32.mrb[9].mxu1 }
 0x24f   : > { %v839_v38 = vadd.f32 %v1885_v18, %v838_v37  ;;  %v1265_v39 = vpop.f32.mrb[10].mxu1 }
 0x250   : > { %943 = vst [vmem:[%s1889_s9 + $0x50] sm:$0xff] %v847_v36  ;;  %v850_v40 = vadd.f32 %v1265_v39, %v1885_v18  ;;  %v841_v41 = vpop.f32.mrb[11].mxu1 }
 0x251   : > { %941 = vst [vmem:[%s1889_s9 + $0x40] sm:$0xff] %v839_v38  ;;  %v842_v42 = vadd.f32 %v1885_v18, %v841_v41 }
 0x252   : > { %944 = vst [vmem:[%s1889_s9 + $0x58] sm:$0xff] %v850_v40 }
 0x253   : > { %942 = vst [vmem:[%s1889_s9 + $0x48] sm:$0xff] %v842_v42 }
 0x255   : > { %v1268_v43 = vpop.f32.mrb[12].mxu1 }
 0x256   : > { %v863_v44 = vadd.f32 %v1268_v43, %v1885_v18  ;;  %v854_v45 = vpop.f32.mrb[13].mxu1 }
 0x257   : > { %v855_v46 = vadd.f32 %v1885_v18, %v854_v45  ;;  %v1269_v47 = vpop.f32.mrb[14].mxu1 }
 0x258   : > { %947 = vst [vmem:[%s1889_s9 + $0x70] sm:$0xff] %v863_v44  ;;  %v866_v48 = vadd.f32 %v1269_v47, %v1885_v18  ;;  %v857_v49 = vpop.f32.mrb[15].mxu1 }
 0x259   : > { %945 = vst [vmem:[%s1889_s9 + $0x60] sm:$0xff] %v855_v46  ;;  %v858_v50 = vadd.f32 %v1885_v18, %v857_v49 }
 0x25a   : > { %948 = vst [vmem:[%s1889_s9 + $0x78] sm:$0xff] %v866_v48 }
 0x25b   : > { %946 = vst [vmem:[%s1889_s9 + $0x68] sm:$0xff] %v858_v50 }
 0x25d   : > { %v1272_v51 = vpop.f32.mrb[16].mxu1 }
 0x25e   : > { %v879_v52 = vadd.f32 %v1272_v51, %v1885_v18  ;;  %v870_v53 = vpop.f32.mrb[17].mxu1 }
 0x25f   : > { %v871_v54 = vadd.f32 %v1885_v18, %v870_v53  ;;  %v1273_v55 = vpop.f32.mrb[18].mxu1 }
 0x260   : > { %951 = vst [vmem:[%s1889_s9 + $0x90] sm:$0xff] %v879_v52  ;;  %v882_v56 = vadd.f32 %v1273_v55, %v1885_v18  ;;  %v873_v57 = vpop.f32.mrb[19].mxu1 }
 0x261   : > { %949 = vst [vmem:[%s1889_s9 + $0x80] sm:$0xff] %v871_v54  ;;  %v874_v58 = vadd.f32 %v1885_v18, %v873_v57 }
 0x262   : > { %952 = vst [vmem:[%s1889_s9 + $0x98] sm:$0xff] %v882_v56 }
 0x263   : > { %950 = vst [vmem:[%s1889_s9 + $0x88] sm:$0xff] %v874_v58 }
 0x265   : > { %v1276_v59 = vpop.f32.mrb[20].mxu1 }
 0x266   : > { %v895_v60 = vadd.f32 %v1276_v59, %v1885_v18  ;;  %v886_v61 = vpop.f32.mrb[21].mxu1 }
 0x267   : > { %v887_v62 = vadd.f32 %v1885_v18, %v886_v61  ;;  %v1277_v63 = vpop.f32.mrb[22].mxu1 }
 0x268   : > { %955 = vst [vmem:[%s1889_s9 + $0xb0] sm:$0xff] %v895_v60  ;;  %v898_v0 = vadd.f32 %v1277_v63, %v1885_v18  ;;  %v889_v1 = vpop.f32.mrb[23].mxu1 }
 0x269   : > { %953 = vst [vmem:[%s1889_s9 + $0xa0] sm:$0xff] %v887_v62  ;;  %v890_v2 = vadd.f32 %v1885_v18, %v889_v1 }
 0x26a   : > { %956 = vst [vmem:[%s1889_s9 + $0xb8] sm:$0xff] %v898_v0 }
 0x26b   : > { %954 = vst [vmem:[%s1889_s9 + $0xa8] sm:$0xff] %v890_v2 }
 0x26d   : > { %v1280_v3 = vpop.f32.mrb[24].mxu1 }
 0x26e   : > { %v911_v4 = vadd.f32 %v1280_v3, %v1885_v18  ;;  %v902_v5 = vpop.f32.mrb[25].mxu1 }
 0x26f   : > { %v903_v6 = vadd.f32 %v1885_v18, %v902_v5  ;;  %v1281_v7 = vpop.f32.mrb[26].mxu1 }
 0x270   : > { %959 = vst [vmem:[%s1889_s9 + $0xd0] sm:$0xff] %v911_v4  ;;  %v914_v8 = vadd.f32 %v1281_v7, %v1885_v18  ;;  %v905_v9 = vpop.f32.mrb[27].mxu1 }
 0x271   : > { %957 = vst [vmem:[%s1889_s9 + $0xc0] sm:$0xff] %v903_v6  ;;  %v906_v10 = vadd.f32 %v1885_v18, %v905_v9 }
 0x272   : > { %960 = vst [vmem:[%s1889_s9 + $0xd8] sm:$0xff] %v914_v8 }
 0x273   : > { %958 = vst [vmem:[%s1889_s9 + $0xc8] sm:$0xff] %v906_v10 }
 0x275   : > { %v1284_v11 = vpop.f32.mrb[28].mxu1 }
 0x276   : > { %v927_v12 = vadd.f32 %v1284_v11, %v1885_v18  ;;  %v918_v13 = vpop.f32.mrb[29].mxu1 }
 0x277   : > { %v919_v14 = vadd.f32 %v1885_v18, %v918_v13  ;;  %v1285_v15 = vpop.f32.mrb[30].mxu1 }
 0x278   : > { %963 = vst [vmem:[%s1889_s9 + $0xf0] sm:$0xff] %v927_v12  ;;  %v930_v16 = vadd.f32 %v1285_v15, %v1885_v18  ;;  %v921_v17 = vpop.f32.mrb[31].mxu1 }
 0x279   : > { %961 = vst [vmem:[%s1889_s9 + $0xe0] sm:$0xff] %v919_v14  ;;  %v922_v19 = vadd.f32 %v1885_v18, %v921_v17 }
 0x27a   : > { %964 = vst [vmem:[%s1889_s9 + $0xf8] sm:$0xff] %v930_v16 }
 0x27b   : > { %962 = vst [vmem:[%s1889_s9 + $0xe8] sm:$0xff] %v922_v19 }
 0x27c   : > { %1504 = shalt.err (!%p1501_p11)
}
 0x27d   : > { %s1505_s28 = scalar_lea.hbm %s1954_s14, 4096  ;;  %s1509_s6 = scalar_lea.hbm %s2014_s5, 8192 }
 0x27e   : > { %p1506_p0 = scmp.ne.s32.totalorder %s1954_s14, %s1505_s28  ;;  %p1510_p6 = scmp.lt.u32.totalorder %s1954_s14, %s2014_s5 }
 0x27f   : > { %p1511_p7 = scmp.lt.u32.totalorder %s1509_s6, %s1505_s28  ;;  %p1513_p8 = scmp.lt.u32.totalorder %s1505_s28, %s1954_s14 }
 0x280   : > { %p1507_p4 = pnand %p1506_p0, %p2031_p12 }
 0x281   : > { %p1512_p2 = por %p1511_p7, %p1510_p6 }
 0x282   : > { %p1508_p13 = pneg %p1507_p4 }
 0x283   : > { %p1514_p1 = por %p1513_p8, %p1512_p2 }
 0x285   : > { %p1515_p10 = pnand %p1514_p1, %p1508_p13 }
 0x287   : > { %1518 = shalt.err (!%p1515_p10)
}
 0x288   : > { %s1585_s16 = smov 128   ;;  %s1586_s7 = smov 8  }
 0x289   : > { %1296 = dma.vmem_to_hbm [thread:$0]  (%p2031_p12), %s1956_s12, 4096, %s1954_s14, %s966_s21, %s1585_s16, %s1585_s16, %s1586_s7  }
 0x28a PF: > { %s996_s27 = sand.u32 1, %s1557_s18   ;;  %p2032_p3 = scmp.ne.s32.totalorder %s2023_s29, 0 }
 0x28b   : > { %p2033_p5 = scmp.ge.s32.totalorder %s1577_s23, 2  ;;  %s997_s15 = scalar_lea.sflag [#allocation4], %s996_s27 }
 0x28d   : > { %p1310_p9 = pnand %p2033_p5, %p2032_p3 }
 0x28f   : > { %1552 = dma.done.wait (!%p1310_p9), %s997_s15, 4096  }
 0x290   : > { %1554 = vsyncadd (!%p1310_p9), %s997_s15, 4294963200  ;;  %s22_s23 = sadd.s32 1, %s1577_s23   ;;  %s2034_s18 = smov %s1561_s19 }
 0x291   : > { %p19_p11 = scmp.ge.s32.totalorder %s22_s23, 4   ;;  %s2035_s19 = smov %s1565_s20 }
 0x292   : > { %s2036_s20 = smov %s1765_s17  ;;  %s2037_s21 = smov %s1573_s22 }
 0x293   : > { %s2038_s22 = smov %s2040_s8  ;;  %21 = sbr.rel (!%p19_p11) target bundleno = 7 (0x7), region = 93 }
 0x29a   :  { %1002 = vsyncpa [#allocation3], 1 }
 0x29b   :  { %1004 = vsyncpa [#allocation3 + $0x1], 1 }
 0x29c   :  { %1005 = vsyncpa [#allocation6], 1 }
 0x29d   :  { %1006 = vsyncpa [#allocation4], 1 }
 0x29e   :  { %1008 = vsyncpa [#allocation4 + $0x1], 1 }

</bundles_post_ra>
